<compile_context>
chip_gen: v7x
topology: tpu7x:2x2x1
jax: 0.10.0
libtpu: 0.0.40
codegen_flags: <defaults>
</compile_context>

<pallas_src>
import math

import jax
import jax.numpy as jnp
import numpy as np
from jax.experimental import pallas as pl
from jax.experimental.pallas import tpu as pltpu

TEMPORAL_WIDTH = 4
W_INIT_VARIANCE_SCALE = 0.01
_LANES = 128


def _make_conv1d_kernel(temporal_width, halo, compute_dtype):
    tw = temporal_width
    cdt = compute_dtype

    def kernel(xh_ref, x_ref, sh_ref, s_ref, w_ref, b_ref, o_ref):
        # xh_ref: (1, halo, td)  last `halo` rows of the previous T tile
        # x_ref:  (1, TT,  td)   current activation tile
        # sh_ref: (1, halo, 1)   segment positions of the halo rows
        # s_ref:  (1, TT,  1)    segment positions of the current tile
        # w_ref:  (tw, td)       depthwise temporal filter (channel tile)
        # b_ref:  (1, td)        bias (channel tile)
        # o_ref:  (1, TT, td)    output tile
        ti = pl.program_id(2)
        x_tile = x_ref[...].astype(cdt)                       # (1, TT, td)
        w_all = w_ref[...].astype(cdt)                        # (tw, td)
        bias = b_ref[...].astype(jnp.float32)                 # (1, td)

        # Tap s == 0: no shift and no document mask; accumulate in f32.
        w_last = w_all[tw - 1: tw, :]                         # (1, td)
        acc = (x_tile * w_last).astype(jnp.float32) + bias

        if tw > 1:
            TT = x_tile.shape[1]
            # Halo rows are only valid after the first T tile (causal
            # zero-padding at sequence start otherwise).
            live = (ti > 0).astype(cdt)
            halo_x = xh_ref[...].astype(cdt) * live           # (1, halo, td)
            nb_halo = (sh_ref[...] != 0).astype(cdt) * live   # (1, halo, 1)
            nb_tile = (s_ref[...] != 0).astype(cdt)           # (1, TT, 1)

            # Extended tile: [previous rows | current rows]; both pieces are
            # sublane aligned (halo and TT are multiples of 16).
            x_ext = jnp.concatenate([halo_x, x_tile], axis=1)     # (1, halo+TT, td)
            nb_ext = jnp.concatenate([nb_halo, nb_tile], axis=1)  # (1, halo+TT, 1)

            mask = None
            for s in range(1, tw):            # unrolled at trace time, tw <= 4
                # mask_s[t] = prod_{j=1..s} nb[t - s + j]  (tiny (1, TT, 1) column)
                nb_s = nb_ext[:, halo - s + 1: halo - s + 1 + TT, :]
                mask = nb_s if mask is None else mask * nb_s
                win = x_ext[:, halo - s: halo - s + TT, :]         # x[t - s]
                w_s = w_all[tw - 1 - s: tw - s, :]                 # (1, td)
                acc = acc + ((win * mask) * w_s).astype(jnp.float32)

        o_ref[...] = acc.astype(o_ref.dtype)

    return kernel


def _tpu_generation_info():
    """Best-effort (physical VMEM bytes, supports-bf16-VALU)."""
    vmem = 64 << 20  # conservative default (v7x per-core VMEM)
    try:
        vmem = int(pltpu.get_tpu_info().vmem_capacity_bytes)
    except Exception:
        pass
    kind = ""
    try:
        kind = jax.devices()[0].device_kind.lower()
    except Exception:
        pass
    bf16_valu = ("v6" in kind) or ("v7" in kind)   # v5e/v4 have no bf16 VALU
    return vmem, bf16_valu


def conv1d_forward(x, segment_pos, w, b, temporal_width=TEMPORAL_WIDTH,
                   return_cache=True, tile_d=512, t_tile=None):
    """Training-mode (cache=None) Conv1D forward. Returns (output, new_cache)."""
    B, T, D = x.shape
    assert segment_pos.shape == (B, T)
    assert w.shape == (temporal_width, D) and b.shape == (D,)

    phys_vmem, bf16_valu = _tpu_generation_info()
    compute_dtype = (jnp.bfloat16
                     if (x.dtype == jnp.bfloat16 and bf16_valu) else jnp.float32)

    # ---- lane-dense channel tile (multiple of 128; padded lanes sliced off) --
    tile_d = max(_LANES, (int(tile_d) // _LANES) * _LANES)
    td = min(pl.cdiv(D, _LANES) * _LANES, tile_d)
    Dp = pl.cdiv(D, td) * td
    n_d = Dp // td

    # ---- temporal tile sized against the per-generation VMEM budget ---------
    halo = 16 * pl.cdiv(max(temporal_width - 1, 1), 16)   # >= tw-1, 16-aligned
    in_b = jnp.dtype(x.dtype).itemsize
    c_b = jnp.dtype(compute_dtype).itemsize
    # double-buffered x & out blocks + f32 accumulator + ~4 compute temporaries
    per_elem = 4 * in_b + 4 + 4 * c_b
    budget = int(phys_vmem * 0.5)
    tt_cap = 2048 if phys_vmem <= (64 << 20) else 4096
    if t_tile is not None:
        TT = max(halo, (int(t_tile) // halo) * halo)
    else:
        TT = (budget // (td * per_elem)) // halo * halo
        TT = max(halo, min(TT, tt_cap))
    TT = min(TT, pl.cdiv(T, halo) * halo)
    Tp = pl.cdiv(T, TT) * TT
    n_t = Tp // TT

    # ---- pad to lane/sublane-dense shapes.  Extra rows/lanes are causal-safe
    #      (conv only looks back) and are sliced off below. -------------------
    xp = x if (Tp == T and Dp == D) else jnp.pad(x, ((0, 0), (0, Tp - T), (0, Dp - D)))
    segp = segment_pos.astype(jnp.int32)
    if Tp != T:
        segp = jnp.pad(segp, ((0, 0), (0, Tp - T)))
    seg3 = segp.reshape(B, Tp, 1)
    wp = w if Dp == D else jnp.pad(w, ((0, 0), (0, Dp - D)))
    bp = (b if Dp == D else jnp.pad(b, (0, Dp - D))).reshape(1, Dp)

    # ---- VMEM accounting (double-buffered blocks + in-kernel temporaries) ---
    footprint = (TT * td * per_elem
                 + halo * td * (2 * in_b + c_b)
                 + 2 * temporal_width * td * 4 + 2 * td * 4
                 + 4 * (TT + halo) * 4
                 + (2 << 20))
    vmem_limit = int(min(int(phys_vmem * 0.8),
                         max(32 << 20, footprint + (6 << 20))))

    tt_blocks = TT // halo

    def _halo_block(ti):
        # Previous tile's last `halo` rows; clamped (and zeroed in-kernel) at ti==0.
        return jnp.maximum(ti * tt_blocks - 1, 0)

    kernel = _make_conv1d_kernel(temporal_width, halo, compute_dtype)
    out = pl.pallas_call(
        kernel,
        out_shape=jax.ShapeDtypeStruct((B, Tp, Dp), x.dtype),
        grid=(B, n_d, n_t),
        in_specs=[
            pl.BlockSpec((1, halo, td), lambda bi, di, ti: (bi, _halo_block(ti), di)),
            pl.BlockSpec((1, TT, td), lambda bi, di, ti: (bi, ti, di)),
            pl.BlockSpec((1, halo, 1), lambda bi, di, ti: (bi, _halo_block(ti), 0)),
            pl.BlockSpec((1, TT, 1), lambda bi, di, ti: (bi, ti, 0)),
            pl.BlockSpec((temporal_width, td), lambda bi, di, ti: (0, di)),
            pl.BlockSpec((1, td), lambda bi, di, ti: (0, di)),
        ],
        out_specs=pl.BlockSpec((1, TT, td), lambda bi, di, ti: (bi, ti, di)),
        compiler_params=pltpu.CompilerParams(
            dimension_semantics=("parallel", "parallel", "parallel"),
            vmem_limit_bytes=vmem_limit),
    )(xp, xp, seg3, seg3, wp, bp)

    if Tp != T or Dp != D:
        out = out[:, :T, :D]

    if not return_cache:
        return out, None

    # new_cache = x[:, 1 - temporal_width:], left-padded to temporal_width - 1.
    new_cache = x[:, 1 - temporal_width:, :]
    pad_len = (temporal_width - 1) - new_cache.shape[1]
    if pad_len > 0:
        new_cache = jnp.concatenate(
            [jnp.zeros((B, pad_len, D), x.dtype), new_cache], axis=1)
    return out, new_cache


def conv1d_reference(x, segment_pos, w, b, temporal_width=TEMPORAL_WIDTH):
    """Pure-JAX transcription of the PyTorch forward (cache=None)."""
    B, T, D = x.shape
    nb = (segment_pos != 0).astype(jnp.float32)
    out = jnp.zeros((B, T, D), jnp.float32)
    tw = min(temporal_width, T)
    for s in range(tw):
        start_idx, end_idx = max(-s, 0), T - s
        xw = x[:, start_idx:end_idx]
        mask = jnp.ones((B, end_idx - start_idx), jnp.float32)
        for j in range(1, s + 1):
            mask = mask * nb[:, start_idx + j:end_idx + j]
        xw = xw * mask[:, :, None]
        pad_len = T - xw.shape[1]
        xw = jnp.concatenate(
            [jnp.zeros((B, pad_len, D), xw.dtype), xw], axis=1)
        out = out + xw * w[temporal_width - s - 1][None, None, :]
    return out + b[None, None, :]


if __name__ == "__main__":
    key = jax.random.PRNGKey(0)
    std = math.sqrt(W_INIT_VARIANCE_SCALE / TEMPORAL_WIDTH)

    # ---------- test 1: small shapes, single tile ---------------------------
    B, T, D = 2, 8, 32
    kx, kw, key = jax.random.split(key, 3)
    x = jax.random.normal(kx, (B, T, D), dtype=jnp.float32)
    w = std * jax.random.normal(kw, (TEMPORAL_WIDTH, D), dtype=jnp.float32)
    b = jnp.zeros((D,), dtype=jnp.float32)
    segment_pos = jnp.stack(
        [jnp.arange(T, dtype=jnp.int32),
         jnp.array([0, 1, 2, 3, 0, 1, 2, 3], dtype=jnp.int32)], axis=0)

    out, new_cache = conv1d_forward(x, segment_pos, w, b)
    out = jax.block_until_ready(out)
    new_cache = jax.block_until_ready(new_cache)
    ref = conv1d_reference(x, segment_pos, w, b)
    np.testing.assert_allclose(np.asarray(out), np.asarray(ref),
                               rtol=1e-5, atol=1e-5)
    assert new_cache.shape == (B, TEMPORAL_WIDTH - 1, D)

    # ---------- test 2: T tiling with halo + multiple channel tiles ---------
    B2, T2, D2 = 2, 32, 160       # t_tile=16 -> 2 temporal tiles; td=128 -> 2 channel tiles
    kx2, kw2, key = jax.random.split(key, 3)
    x2 = jax.random.normal(kx2, (B2, T2, D2), dtype=jnp.float32)
    w2 = std * jax.random.normal(kw2, (TEMPORAL_WIDTH, D2), dtype=jnp.float32)
    b2 = 0.1 * jnp.ones((D2,), dtype=jnp.float32)
    seg_row0 = jnp.concatenate(
        [jnp.arange(10), jnp.arange(9), jnp.arange(13)]).astype(jnp.int32)
    seg_row1 = jnp.concatenate(
        [jnp.arange(16), jnp.arange(16)]).astype(jnp.int32)   # boundary at the tile edge
    seg2 = jnp.stack([seg_row0, seg_row1], axis=0)

    out2, _ = conv1d_forward(x2, seg2, w2, b2, tile_d=128, t_tile=16)
    out2 = jax.block_until_ready(out2)
    ref2 = conv1d_reference(x2, seg2, w2, b2)
    np.testing.assert_allclose(np.asarray(out2), np.asarray(ref2),
                               rtol=1e-5, atol=1e-5)

    # ---------- test 3: bf16 inputs (bf16 compute on v6e/v7x, f32 elsewhere) -
    B3, T3, D3 = 2, 24, 192
    kx3, kw3, key = jax.random.split(key, 3)
    x3 = jax.random.normal(kx3, (B3, T3, D3), dtype=jnp.float32).astype(jnp.bfloat16)
    w3 = (std * jax.random.normal(kw3, (TEMPORAL_WIDTH, D3),
                                  dtype=jnp.float32)).astype(jnp.bfloat16)
    b3 = jnp.full((D3,), 0.05, dtype=jnp.bfloat16)
    segpos3 = jnp.stack(
        [jnp.arange(T3, dtype=jnp.int32),
         jnp.concatenate([jnp.arange(15), jnp.arange(9)]).astype(jnp.int32)], axis=0)

    out3, _ = conv1d_forward(x3, segpos3, w3, b3, t_tile=16)
    out3 = jax.block_until_ready(out3)
    ref3 = conv1d_reference(x3.astype(jnp.float32), segpos3,
                            w3.astype(jnp.float32), b3.astype(jnp.float32))
    np.testing.assert_allclose(np.asarray(out3, dtype=np.float32), np.asarray(ref3),
                               rtol=1e-2, atol=1e-2)

    print("KERNEL_OK")
</pallas_src>

<mosaic_0001>
module attributes {stable_mosaic.version = 11 : i64} {
  func.func @kernel(%arg0: i32, %arg1: i32, %arg2: i32, %arg3: memref<1x16x128xf32, #tpu.memory_space<vmem>>, %arg4: memref<1x16x128xf32, #tpu.memory_space<vmem>>, %arg5: memref<1x16x1xi32, #tpu.memory_space<vmem>>, %arg6: memref<1x16x1xi32, #tpu.memory_space<vmem>>, %arg7: memref<4x128xf32, #tpu.memory_space<vmem>>, %arg8: memref<1x128xf32, #tpu.memory_space<vmem>>, %arg9: memref<1x16x128xf32, #tpu.memory_space<vmem>>) attributes {dimension_semantics = [#tpu.dimension_semantics<parallel>, #tpu.dimension_semantics<parallel>, #tpu.dimension_semantics<parallel>], iteration_bounds = array<i64: 2, 1, 1>, scalar_prefetch = 0 : i64, scratch_operands = 0 : i64, tpu.core_type = #tpu.core_type<tc>, window_params = [{transform_indices = @transform_0, window_bounds = array<i64: 1, 16, 128>}, {transform_indices = @transform_1, window_bounds = array<i64: 1, 16, 128>}, {transform_indices = @transform_2, window_bounds = array<i64: 1, 16, 1>}, {transform_indices = @transform_3, window_bounds = array<i64: 1, 16, 1>}, {transform_indices = @transform_4, window_bounds = array<i64: 4, 128>}, {transform_indices = @transform_5, window_bounds = array<i64: 1, 128>}, {transform_indices = @transform_6, window_bounds = array<i64: 1, 16, 128>}]} {
    %c0 = arith.constant 0 : index
    %c0_0 = arith.constant 0 : index
    %c0_1 = arith.constant 0 : index
    %0 = vector.load %arg4[%c0, %c0_0, %c0_1] : memref<1x16x128xf32, #tpu.memory_space<vmem>>, vector<1x16x128xf32>
    %c0_2 = arith.constant 0 : index
    %c0_3 = arith.constant 0 : index
    %1 = vector.load %arg7[%c0_2, %c0_3] : memref<4x128xf32, #tpu.memory_space<vmem>>, vector<4x128xf32>
    %c0_4 = arith.constant 0 : index
    %c0_5 = arith.constant 0 : index
    %2 = vector.load %arg8[%c0_4, %c0_5] : memref<1x128xf32, #tpu.memory_space<vmem>>, vector<1x128xf32>
    %3 = vector.extract_strided_slice %1 {offsets = [3, 0], sizes = [1, 128], strides = [1, 1]} : vector<4x128xf32> to vector<1x128xf32>
    %4 = vector.shape_cast %3 : vector<1x128xf32> to vector<1x1x128xf32>
    %5 = vector.broadcast %4 : vector<1x1x128xf32> to vector<1x16x128xf32>
    %6 = arith.mulf %0, %5 : vector<1x16x128xf32>
    %7 = vector.shape_cast %2 : vector<1x128xf32> to vector<1x1x128xf32>
    %8 = vector.broadcast %7 : vector<1x1x128xf32> to vector<1x16x128xf32>
    %9 = arith.addf %6, %8 : vector<1x16x128xf32>
    %c0_i32 = arith.constant 0 : i32
    %10 = arith.cmpi sgt, %arg2, %c0_i32 : i32
    %11 = arith.extui %10 : i1 to i32
    %12 = arith.sitofp %11 : i32 to f32
    %c0_6 = arith.constant 0 : index
    %c0_7 = arith.constant 0 : index
    %c0_8 = arith.constant 0 : index
    %13 = vector.load %arg3[%c0_6, %c0_7, %c0_8] : memref<1x16x128xf32, #tpu.memory_space<vmem>>, vector<1x16x128xf32>
    %14 = vector.broadcast %12 : f32 to vector<1x16x128xf32>
    %15 = arith.mulf %13, %14 : vector<1x16x128xf32>
    %c0_9 = arith.constant 0 : index
    %c0_10 = arith.constant 0 : index
    %c0_11 = arith.constant 0 : index
    %16 = vector.load %arg5[%c0_9, %c0_10, %c0_11] : memref<1x16x1xi32, #tpu.memory_space<vmem>>, vector<1x16x1xi32>
    %c0_i32_12 = arith.constant 0 : i32
    %17 = vector.broadcast %c0_i32_12 : i32 to vector<1x16x1xi32>
    %18 = arith.cmpi ne, %16, %17 : vector<1x16x1xi32>
    %19 = arith.extui %18 : vector<1x16x1xi1> to vector<1x16x1xi32>
    %20 = arith.sitofp %19 : vector<1x16x1xi32> to vector<1x16x1xf32>
    %21 = vector.broadcast %12 : f32 to vector<1x16x1xf32>
    %22 = arith.mulf %20, %21 : vector<1x16x1xf32>
    %c0_13 = arith.constant 0 : index
    %c0_14 = arith.constant 0 : index
    %c0_15 = arith.constant 0 : index
    %23 = vector.load %arg6[%c0_13, %c0_14, %c0_15] : memref<1x16x1xi32, #tpu.memory_space<vmem>>, vector<1x16x1xi32>
    %c0_i32_16 = arith.constant 0 : i32
    %24 = vector.broadcast %c0_i32_16 : i32 to vector<1x16x1xi32>
    %25 = arith.cmpi ne, %23, %24 : vector<1x16x1xi32>
    %26 = arith.extui %25 : vector<1x16x1xi1> to vector<1x16x1xi32>
    %27 = arith.sitofp %26 : vector<1x16x1xi32> to vector<1x16x1xf32>
    %28 = tpu.concatenate %15, %0 in 1 : vector<1x16x128xf32>, vector<1x16x128xf32> -> vector<1x32x128xf32>
    %29 = tpu.concatenate %22, %27 in 1 : vector<1x16x1xf32>, vector<1x16x1xf32> -> vector<1x32x1xf32>
    %30 = vector.extract_strided_slice %29 {offsets = [0, 16, 0], sizes = [1, 16, 1], strides = [1, 1, 1]} : vector<1x32x1xf32> to vector<1x16x1xf32>
    %31 = vector.extract_strided_slice %28 {offsets = [0, 15, 0], sizes = [1, 16, 128], strides = [1, 1, 1]} : vector<1x32x128xf32> to vector<1x16x128xf32>
    %32 = vector.extract_strided_slice %1 {offsets = [2, 0], sizes = [1, 128], strides = [1, 1]} : vector<4x128xf32> to vector<1x128xf32>
    %33 = vector.broadcast %30 : vector<1x16x1xf32> to vector<1x16x128xf32>
    %34 = arith.mulf %31, %33 : vector<1x16x128xf32>
    %35 = vector.shape_cast %32 : vector<1x128xf32> to vector<1x1x128xf32>
    %36 = vector.broadcast %35 : vector<1x1x128xf32> to vector<1x16x128xf32>
    %37 = arith.mulf %34, %36 : vector<1x16x128xf32>
    %38 = arith.addf %9, %37 : vector<1x16x128xf32>
    %39 = vector.extract_strided_slice %29 {offsets = [0, 15, 0], sizes = [1, 16, 1], strides = [1, 1, 1]} : vector<1x32x1xf32> to vector<1x16x1xf32>
    %40 = arith.mulf %30, %39 : vector<1x16x1xf32>
    %41 = vector.extract_strided_slice %28 {offsets = [0, 14, 0], sizes = [1, 16, 128], strides = [1, 1, 1]} : vector<1x32x128xf32> to vector<1x16x128xf32>
    %42 = vector.extract_strided_slice %1 {offsets = [1, 0], sizes = [1, 128], strides = [1, 1]} : vector<4x128xf32> to vector<1x128xf32>
    %43 = vector.broadcast %40 : vector<1x16x1xf32> to vector<1x16x128xf32>
    %44 = arith.mulf %41, %43 : vector<1x16x128xf32>
    %45 = vector.shape_cast %42 : vector<1x128xf32> to vector<1x1x128xf32>
    %46 = vector.broadcast %45 : vector<1x1x128xf32> to vector<1x16x128xf32>
    %47 = arith.mulf %44, %46 : vector<1x16x128xf32>
    %48 = arith.addf %38, %47 : vector<1x16x128xf32>
    %49 = vector.extract_strided_slice %29 {offsets = [0, 14, 0], sizes = [1, 16, 1], strides = [1, 1, 1]} : vector<1x32x1xf32> to vector<1x16x1xf32>
    %50 = arith.mulf %40, %49 : vector<1x16x1xf32>
    %51 = vector.extract_strided_slice %28 {offsets = [0, 13, 0], sizes = [1, 16, 128], strides = [1, 1, 1]} : vector<1x32x128xf32> to vector<1x16x128xf32>
    %52 = vector.extract_strided_slice %1 {offsets = [0, 0], sizes = [1, 128], strides = [1, 1]} : vector<4x128xf32> to vector<1x128xf32>
    %53 = vector.broadcast %50 : vector<1x16x1xf32> to vector<1x16x128xf32>
    %54 = arith.mulf %51, %53 : vector<1x16x128xf32>
    %55 = vector.shape_cast %52 : vector<1x128xf32> to vector<1x1x128xf32>
    %56 = vector.broadcast %55 : vector<1x1x128xf32> to vector<1x16x128xf32>
    %57 = arith.mulf %54, %56 : vector<1x16x128xf32>
    %58 = arith.addf %48, %57 : vector<1x16x128xf32>
    %c0_17 = arith.constant 0 : index
    %c0_18 = arith.constant 0 : index
    %c0_19 = arith.constant 0 : index
    %59 = vector.load %arg9[%c0_17, %c0_18, %c0_19] : memref<1x16x128xf32, #tpu.memory_space<vmem>>, vector<1x16x128xf32>
    tpu.vector_store %arg9[%c0_17, %c0_18, %c0_19], %58 {strides = array<i32>} : memref<1x16x128xf32, #tpu.memory_space<vmem>>, vector<1x16x128xf32>,
    return
  }
  func.func @transform_0(%arg0: i32, %arg1: i32, %arg2: i32) -> (i32, i32, i32) {
    %c1_i32 = arith.constant 1 : i32
    %0 = arith.muli %arg2, %c1_i32 : i32
    %c1_i32_0 = arith.constant 1 : i32
    %1 = arith.subi %0, %c1_i32_0 : i32
    %c0_i32 = arith.constant 0 : i32
    %2 = arith.maxsi %1, %c0_i32 : i32
    %c0_i32_1 = arith.constant 0 : i32
    return %arg0, %2, %arg1 : i32, i32, i32
  }
  func.func @transform_1(%arg0: i32, %arg1: i32, %arg2: i32) -> (i32, i32, i32) {
    %c0_i32 = arith.constant 0 : i32
    return %arg0, %arg2, %arg1 : i32, i32, i32
  }
  func.func @transform_2(%arg0: i32, %arg1: i32, %arg2: i32) -> (i32, i32, i32) {
    %c1_i32 = arith.constant 1 : i32
    %0 = arith.muli %arg2, %c1_i32 : i32
    %c1_i32_0 = arith.constant 1 : i32
    %1 = arith.subi %0, %c1_i32_0 : i32
    %c0_i32 = arith.constant 0 : i32
    %2 = arith.maxsi %1, %c0_i32 : i32
    %c0_i32_1 = arith.constant 0 : i32
    %c0_i32_2 = arith.constant 0 : i32
    return %arg0, %2, %c0_i32_1 : i32, i32, i32
  }
  func.func @transform_3(%arg0: i32, %arg1: i32, %arg2: i32) -> (i32, i32, i32) {
    %c0_i32 = arith.constant 0 : i32
    %c0_i32_0 = arith.constant 0 : i32
    return %arg0, %arg2, %c0_i32 : i32, i32, i32
  }
  func.func @transform_4(%arg0: i32, %arg1: i32, %arg2: i32) -> (i32, i32) {
    %c0_i32 = arith.constant 0 : i32
    %c0_i32_0 = arith.constant 0 : i32
    return %c0_i32, %arg1 : i32, i32
  }
  func.func @transform_5(%arg0: i32, %arg1: i32, %arg2: i32) -> (i32, i32) {
    %c0_i32 = arith.constant 0 : i32
    %c0_i32_0 = arith.constant 0 : i32
    return %c0_i32, %arg1 : i32, i32
  }
  func.func @transform_6(%arg0: i32, %arg1: i32, %arg2: i32) -> (i32, i32, i32) {
    %c0_i32 = arith.constant 0 : i32
    return %arg0, %arg2, %arg1 : i32, i32, i32
  }
}

</mosaic_0001>

<bundles_post_ra>
// kernel: tpu_custom_call.1
= control target key start
LH: loop header
LB: loop body
LE: loop exit
PB: predicated region body
PF: predicated region fallthrough
CT: control target
= control target key end

     0   :  { %11 = vsyncpa [#allocation3], 0  ;;  %s1217_s0 = inlined_call_operand.vmem [shape: f32[2,16,128], index: 0, kind: input, shape index: {}]   ;;  %s1218_s1 = inlined_call_operand.vmem [shape: f32[2,16,128], index: 1, kind: input, shape index: {}]   ;;  %s1219_s2 = inlined_call_operand.vmem [shape: s32[2,16,1], index: 2, kind: input, shape index: {}]   ;;  %s1220_s3 = inlined_call_operand.vmem [shape: s32[2,16,1], index: 3, kind: input, shape index: {}]   ;;  %s1221_s4 = inlined_call_operand.vmem [shape: f32[4,128], index: 4, kind: input, shape index: {}]   ;;  %s1222_s5 = inlined_call_operand.vmem [shape: f32[1,128], index: 5, kind: input, shape index: {}]   ;;  %s1223_s6 = inlined_call_operand.hbm [shape: f32[2,16,128], index: 6, kind: output, shape index: {}]  }
   0x1   :  { %13 = vsyncpa [#allocation3 + $0x1], 0  ;;  %s1068_s21 = smov 0   ;;  %s1070_s22 = smov 0  }
   0x2   :  { %s1072_s23 = smov 0   ;;  %s1074_s24 = smov 0  }
   0x3   :  { %s1076_s25 = smov 0   ;;  %s1078_s26 = smov 0  }
   0x4 LB: > { %s852_s27 = sadd.s32 4294967295, %s1026_s26   ;;  %s853_s28 = sadd.s32 4294967294, %s1026_s26   ;;  %s1026_s26 = sphi %s1078_s26, %s19_s26   ;;  %s1022_s25 = sphi %s1076_s25, %s1230_s25   ;;  %s1018_s24 = sphi %s1074_s24, %s1229_s24   ;;  %s1014_s23 = sphi %s1072_s23, %s1228_s23   ;;  %s1010_s22 = sphi %s1070_s22, %s1227_s22   ;;  %s1006_s21 = sphi %s1068_s21, %s1226_s21  }
   0x5   : > { %s38_s29 = sadd.s32 1, %s1022_s25  ;;  %s229_s30 = sadd.s32 1, %s1014_s23 }
   0x6   : > { %p40_p0 = scmp.ge.s32.totalorder %s38_s29, 2  ;;  %p239_p1 = scmp.ne.s32.totalorder %s1014_s23, %s1010_s22 }
   0x7   : > { %p240_p2 = scmp.eq.s32.totalorder %s852_s27, 1  ;;  %p245_p3 = scmp.ne.s32.totalorder %s1010_s22, %s1006_s21 }
   0x8   : > { %s1232_s29 = smov (%p40_p0, %s38_s29), 0  ;;  %p246_p5 = scmp.eq.s32.totalorder %s853_s28, 1 }
   0x9   : > { %p1108_p4 = por %p240_p2, %p239_p1  ;;  %s222_s8 = ssub.s32 %s1022_s25, %s1232_s29 }
   0xa   : > { %p858_p6 = scmp.ge.s32.totalorder %s1026_s26, 1  ;;  %p227_p7 = scmp.eq.s32.totalorder %s222_s8, 0 }
   0xb   : > { %p1115_p8 = por %p246_p5, %p245_p3  ;;  %p347_p9 = scmp.lt.s32.totalorder %s1026_s26, 3 }
   0xc   : > { %s1121_s10 = scalar_select %p227_p7, %s1014_s23, %s229_s30  }
   0xd   : > { %p348_p10 = pnand %p858_p6, %p347_p9 }
   0xe   : > { %p431_p11 = scmp.lt.s32.totalorder (!%p348_p10), %s1018_s24, 1  ;;  %v1028_v0 = vmov (!%p348_p10), 0   ;;  %v1029_v4 = vmov (!%p348_p10), 0.0   ;;  %vm558_vm3 = vcmask (!%p348_p10), 1040384   ;;  %vm606_vm4 = vcmask (!%p348_p10), 1041408   ;;  %s881_s17 = sshll.u32 (!%p348_p10), %s1018_s24, 8 }
   0xf   : > { %351 = sbr.rel (%p348_p10) target bundleno = 196 (0xc4), region = 44  ;;  %941 = vset.pattern.permute.xlu0 (!%p348_p10), %v1028_v0  ;;  %947 = vset.pattern.permute.xlu1 (!%p348_p10), %v1028_v0  ;;  %v497_v24 = vlaneseq (!%p348_p10)  ;;  %v495_v27 = vld [vmem:[%s1221_s4] sm:$0xf] (!%p348_p10)  ;;  %vm538_vm5 = vcmask (!%p348_p10), 1046528   ;;  %vm586_vm6 = vcmask (!%p348_p10), 1045504   ;;  %vm633_vm7 = vcmask (!%p348_p10), 1044480   ;;  %s1165_s28 = scalar_lea.hbm (!%p348_p10), %s1223_s6, %s881_s17 }
  0x10   : > { %v868_v43 = vld [vmem:[%s1222_s5] ss:$0 sm:$0xff] (!%p348_p10)  ;;  %vm653_vm8 = vcmask (!%p348_p10), 1042432   ;;  %s1030_s8 = smov (!%p348_p10), [#allocation2]  }
  0x11   : > { %v498_v25 = vshrl.u32 (!%p348_p10), %v497_v24, 7 }
  0x13   : > { %v499_v26 = vsub.s32 (!%p348_p10), 3, %v498_v25  ;;  %v550_v30 = vsub.s32 (!%p348_p10), 2, %v498_v25  ;;  %v598_v32 = vsub.s32 (!%p348_p10), 1, %v498_v25  ;;  %v645_v54 = vsub.s32 (!%p348_p10), 0, %v498_v25 }
  0x15   : > { %v500_v29 = vrot.slane (!%p348_p10), %v495_v27, %v499_v26  ;;  %v551_v38 = vrot.slane (!%p348_p10), %v495_v27, %v550_v30  ;;  %v599_v45 = vrot.slane (!%p348_p10), %v495_v27, %v598_v32 }
  0x16   : > { %s432_s11 = scalar_select %p431_p11, %s1018_s24, 1 }
  0x18   : > { %s1125_s12 = sshll.u32 %s432_s11, 4  ;;  %s952_s11 = sshll.u32 %s1030_s8, 4  ;;  %s953_s11 = int_to_ptr.vmem [resolvable:$false] %s952_s11 }
  0x19   : > { %s483_s15 = scalar_lea.vmem %s1220_s3, %s1125_s12  ;;  %s470_s18 = scalar_lea.vmem %s1219_s2, %s1125_s12 }
  0x1a   : > { %v522_v1 = vld [vmem:[%s483_s15] sm:$0xff]  ;;  %v523_v2 = vld [vmem:[%s483_s15 + $0x8] sm:$0xff]  ;;  %s441_s27 = scalar_lea.vmem %s1217_s0, %s1125_s12  ;;  %s457_s13 = scalar_lea.vmem %s1218_s1, %s1125_s12 }
  0x1b   : > { %v517_v3 = vld [vmem:[%s470_s18 + $0x8] sm:$0xff]  ;;  %vm524_vm0 = vcmp.ne.s32.totalorder %v522_v1, 0  ;;  %vm525_vm1 = vcmp.ne.s32.totalorder %v523_v2, 0  ;;  %v493_v36 = vld [vmem:[%s457_s13] sm:$0xff]  ;;  %s424_s12 = sand.u32 1, %s1010_s22  }
  0x1c   : > { %vm518_vm2 = vcmp.ne.s32.totalorder %v517_v3, 0  ;;  %v870_v5 = vsel %vm524_vm0, 1.0, %v1029_v4  ;;  %v871_v6 = vsel %vm525_vm1, 1.0, %v1029_v4  ;;  %v514_v28 = vld [vmem:[%s441_s27 + $0x8] sm:$0xff]  ;;  %v501_v40 = vmul.f32 %v500_v29, %v493_v36  ;;  %s859_s16 = sshll.u32 %s424_s12, 4  ;;  %s1171_s24 = scalar_lea.sflag [#allocation3], %s424_s12 }
  0x1d   : > { %v869_v7 = vsel %vm518_vm2, 1.0, %v1029_v4  ;;  %v942_v8 = vpack.i.bf16 %v871_v6, %v870_v5  ;;  %v570_v10 = vrot.slane %v870_v5, 7  ;;  %v572_v11 = vrot.slane %v871_v6, 7  ;;  %v494_v37 = vld [vmem:[%s457_s13 + $0x8] sm:$0xff]  ;;  %s426_s18 = scalar_lea.vmem [#allocation2], %s859_s16  ;;  %s954_s13 = scalar_lea.vmem %s953_s11, 512 }
  0x1e   : > { %v521_v9 = vmul.f32 0.0, %v869_v7  ;;  %v617_v12 = vrot.slane %v870_v5, 6  ;;  %v619_v13 = vrot.slane %v871_v6, 6  ;;  %v516_v35 = vmul.f32 0.0, %v514_v28  ;;  %s682_s19 = sshll.u32 %s426_s18, 4  ;;  %s1167_s19 = int_to_ptr.vmem [resolvable:$true] %s682_s19 }
  0x1f   : > { %943 = vperm.xlu0 %941, %v942_v8   ;;  %v573_v14 = vsel %vm558_vm3, %v570_v10, %v572_v11  ;;  %v502_v44 = vmul.f32 %v500_v29, %v494_v37  ;;  %v509_v55 = vadd.f32 %v868_v43, %v501_v40  ;;  %s948_s30 = scalar_lea.vmem %s1167_s19, 256  ;;  %p955_p1 = scmp.lt.s32.totalorder %s1167_s19, %s953_s11 }
  0x20   : > { %v569_v15 = vrot.slane %v521_v9, 7  ;;  %v616_v16 = vrot.slane %v521_v9, 6  ;;  %v577_v17 = vmul.f32 %v871_v6, %v573_v14  ;;  %v620_v18 = vsel %vm606_vm4, %v617_v12, %v619_v13  ;;  %p949_p12 = scmp.ne.s32.totalorder %s1167_s19, %s948_s30  ;;  %p956_p2 = scmp.lt.s32.totalorder %s954_s13, %s948_s30 }
  0x21   : > { %v646_v6 = vrot.slane %v495_v27, %v645_v54  ;;  %v510_v8 = vadd.f32 %v868_v43, %v502_v44 }
  0x22   : > { %v571_v19 = vsel %vm558_vm3, %v569_v15, %v570_v10  ;;  %v618_v20 = vsel %vm606_vm4, %v616_v16, %v617_v12  ;;  %584 = vperm.xlu1 %947, %v577_v17   ;;  %v624_v22 = vmul.f32 %v620_v18, %v577_v17  ;;  %p950_p13 = pnand %p949_p12, %p1108_p4  ;;  %p957_p3 = por %p956_p2, %p955_p1 }
  0x23   : > { %v576_v21 = vmul.f32 %v870_v5, %v571_v19 }
  0x24   : > { %p951_p0 = pneg %p950_p13 }
  0x25   : > { %580 = vperm.xlu0 %941, %v576_v21   ;;  %v623_v23 = vmul.f32 %v618_v20, %v576_v21 }
  0x26   : > { %p958_p5 = pnand %p957_p3, %p951_p0 }
  0x27   : > { %627 = vperm.xlu1 %947, %v623_v23  }
  0x29   : > { %631 = vperm.xlu0 %941, %v624_v22  }
  0x9e   : > { %v944_v31 = vpop.permute.xlu0 %943 }
  0x9f   : > { %v946_v33 = vunpack.i.h.bf16 %v944_v31  ;;  %v945_v34 = vunpack.i.l.bf16 %v944_v31 }
  0xa1   : > { %v540_v39 = vrot.slane %v946_v33, 1  ;;  %v539_v41 = vrot.slane %v945_v34, 1  ;;  %v585_v42 = vpop.permute.xlu1 %584 }
  0xa2   : > { %v588_v46 = vrot.slane %v585_v42, 2 }
  0xa3   : > { %v541_v47 = vsel %vm538_vm5, %v539_v41, %v540_v39  ;;  %v545_v48 = vmul.f32 %v539_v41, %v516_v35  ;;  %v547_v49 = vmul.f32 %v540_v39, %v494_v37 }
  0xa4   : > { %v581_v50 = vpop.permute.xlu0 %580  ;;  %v546_v51 = vmul.f32 %v541_v47, %v493_v36  ;;  %v595_v52 = vmul.f32 %v588_v46, %v494_v37 }
  0xa5   : > { %v587_v53 = vrot.slane %v581_v50, 2  ;;  %v552_v56 = vmul.f32 %v551_v38, %v545_v48  ;;  %v554_v57 = vmul.f32 %v551_v38, %v547_v49 }
  0xa6   : > { %v628_v58 = vpop.permute.xlu1 %627  ;;  %v553_v59 = vmul.f32 %v551_v38, %v546_v51  ;;  %v602_v60 = vmul.f32 %v599_v45, %v595_v52 }
  0xa7   : > { %v589_v61 = vsel %vm586_vm6, %v587_v53, %v588_v46  ;;  %v593_v62 = vmul.f32 %v587_v53, %v516_v35  ;;  %v559_v63 = vrot.slane %v552_v56, 7  ;;  %v562_v0 = vrot.slane %v554_v57, 7 }
  0xa8   : > { %v594_v1 = vmul.f32 %v589_v61, %v493_v36  ;;  %v634_v2 = vrot.slane %v628_v58, 3  ;;  %v632_v3 = vpop.permute.xlu0 %631  ;;  %v560_v4 = vrot.slane %v553_v59, 7  ;;  %v610_v9 = vrot.slane %v602_v60, 6 }
  0xa9   : > { %v600_v5 = vmul.f32 %v599_v45, %v593_v62  ;;  %v635_v7 = vrot.slane %v632_v3, 3 }
  0xaa   : > { %v601_v10 = vmul.f32 %v599_v45, %v594_v1  ;;  %v640_v11 = vmul.f32 %v634_v2, %v516_v35  ;;  %v561_v12 = vsel %vm558_vm3, %v559_v63, %v560_v4  ;;  %v563_v13 = vsel %vm558_vm3, %v560_v4, %v562_v0 }
  0xab   : > { %v607_v14 = vrot.slane %v600_v5, 6  ;;  %v636_v15 = vsel %vm633_vm7, %v634_v2, %v635_v7  ;;  %v642_v19 = vmul.f32 %v635_v7, %v494_v37  ;;  %v566_v20 = vadd.f32 %v561_v12, %v509_v55 }
  0xac   : > { %v608_v16 = vrot.slane %v601_v10, 6  ;;  %v647_v17 = vmul.f32 %v646_v6, %v640_v11  ;;  %v641_v18 = vmul.f32 %v636_v15, %v493_v36  ;;  %v567_v21 = vadd.f32 %v563_v13, %v510_v8 }
  0xad   : > { %v649_v25 = vmul.f32 %v646_v6, %v642_v19 }
  0xae   : > { %v609_v22 = vsel %vm606_vm4, %v607_v14, %v608_v16  ;;  %v611_v23 = vsel %vm606_vm4, %v608_v16, %v610_v9  ;;  %v648_v24 = vmul.f32 %v646_v6, %v641_v18  ;;  %v654_v26 = vrot.slane %v647_v17, 5 }
  0xaf   : > { %v657_v28 = vrot.slane %v649_v25, 5  ;;  %v614_v29 = vadd.f32 %v609_v22, %v566_v20  ;;  %v615_v30 = vadd.f32 %v611_v23, %v567_v21 }
  0xb0   : > { %v655_v27 = vrot.slane %v648_v24, 5 }
  0xb2   : > { %v656_v31 = vsel %vm653_vm8, %v654_v26, %v655_v27  ;;  %v658_v32 = vsel %vm653_vm8, %v655_v27, %v657_v28 }
  0xb3   : > { %v661_v33 = vadd.f32 %v656_v31, %v614_v29  ;;  %v662_v34 = vadd.f32 %v658_v32, %v615_v30 }
  0xb5   : > { %663 = vst [vmem:[%s426_s18] sm:$0xff] %v661_v33  ;;  %664 = vst [vmem:[%s426_s18 + $0x8] sm:$0xff] %v662_v34 }
  0xb6   : > { %961 = shalt.err (!%p958_p5)
}
  0xb7   : > { %s962_s14 = scalar_lea.hbm %s1165_s28, 256  ;;  %s966_s16 = scalar_lea.hbm %s1223_s6, 512 }
  0xb8   : > { %p963_p6 = scmp.ne.s32.totalorder %s1165_s28, %s962_s14  ;;  %p967_p10 = scmp.lt.u32.totalorder %s1165_s28, %s1223_s6 }
  0xb9   : > { %p968_p11 = scmp.lt.u32.totalorder %s966_s16, %s962_s14  ;;  %p970_p13 = scmp.lt.u32.totalorder %s962_s14, %s1165_s28 }
  0xba   : > { %p964_p7 = pnand %p963_p6, %p1108_p4 }
  0xbb   : > { %p969_p12 = por %p968_p11, %p967_p10 }
  0xbc   : > { %p965_p9 = pneg %p964_p7 }
  0xbd   : > { %p971_p0 = por %p970_p13, %p969_p12 }
  0xbf   : > { %p972_p1 = pnand %p971_p0, %p965_p9 }
  0xc1   : > { %975 = shalt.err (!%p972_p1)
}
  0xc2   : > { %s1031_s20 = smov 128   ;;  %s1032_s27 = smov 8  }
  0xc3   : > { %882 = dma.vmem_to_hbm [thread:$0]  (%p1108_p4), %s1167_s19, 256, %s1165_s28, %s1171_s24, %s1031_s20, %s1031_s20, %s1032_s27  }
  0xc4 PF: > { %p888_p2 = scmp.ge.s32.totalorder %s1026_s26, 2  ;;  %s697_s30 = sand.u32 1, %s1006_s21  }
  0xc5   : > { %s698_s8 = scalar_lea.sflag [#allocation3], %s697_s30 }
  0xc6   : > { %p885_p3 = pnand %p888_p2, %p1115_p8 }
  0xc8   : > { %1001 = dma.done.wait (!%p885_p3), %s698_s8, 256  }
  0xc9   : > { %1003 = vsyncadd (!%p885_p3), %s698_s8, 4294967040  ;;  %s19_s26 = sadd.s32 1, %s1026_s26   ;;  %s1226_s21 = smov %s1010_s22 }
  0xca   : > { %p16_p5 = scmp.ge.s32.totalorder %s19_s26, 4   ;;  %s1227_s22 = smov %s1014_s23 }
  0xcb   : > { %s1228_s23 = smov %s1121_s10  ;;  %s1229_s24 = smov %s1022_s25 }
  0xcc   : > { %s1230_s25 = smov %s1232_s29  ;;  %18 = sbr.rel (!%p16_p5) target bundleno = 4 (0x4), region = 94 }
  0xd3   :  { %703 = vsyncpa [#allocation3], 1 }
  0xd4   :  { %705 = vsyncpa [#allocation3 + $0x1], 1 }

</bundles_post_ra>
